<compile_context>
chip_gen: v7x
topology: tpu7x:2x2x1
jax: 0.10.0
libtpu: 0.0.40
codegen_flags: <defaults>
</compile_context>

<pallas_src>
import math
import jax
import jax.numpy as jnp
from jax.experimental import pallas as pl
from jax.experimental.pallas import tpu as pltpu


def _round_up(n, m):
    return ((n + m - 1) // m) * m


def gru_forward(x, h0, w_ih, b_ih, w_hh, b_hh, w1, b1, w2):
    """x: (seq, indim), unbatched time-major (same as PyTorch nn.GRU unbatched).
    Weights are in PyTorch layout (out, in); split / transposed / packed here."""
    seq, indim = x.shape
    H = h0.shape[1]
    outdim = w2.shape[0]
    LANES = 128
    # TODO(synk): for 3*H > 128 the fused-gate packing needs lane tiling.
    assert 3 * H <= LANES, "fused-gate packing assumes 3*hidden <= 128"
    out_pad = pl.cdiv(outdim, 128) * 128                 # lane-dense output slab

    # ---- host-side weight prep (trace-time, free) -------------------------
    w_ir, w_iz, w_in_ = w_ih[0:H], w_ih[H:2 * H], w_ih[2 * H:3 * H]
    w_hr, w_hz, w_hn = w_hh[0:H], w_hh[H:2 * H], w_hh[2 * H:3 * H]
    b_ir, b_iz, b_in_ = b_ih[0:H], b_ih[H:2 * H], b_ih[2 * H:3 * H]
    b_hr, b_hz, b_hn = b_hh[0:H], b_hh[H:2 * H], b_hh[2 * H:3 * H]

    # Fused, gate-aligned weights.  r/z columns pre-scaled by 0.5 so the in-kernel
    # sigmoid becomes 0.5*tanh(pre)+0.5 (one EUP push for r and z together).
    # The additive recurrent biases b_hr/b_hz are folded into the input biases;
    # only b_hn stays in the loop (it is gated by r).
    wih_fused = jnp.concatenate([0.5 * w_ir.T, 0.5 * w_iz.T, w_in_.T], axis=1)      # (indim, 3H)
    whh_fused = jnp.concatenate([0.5 * w_hr.T, 0.5 * w_hz.T, w_hn.T], axis=1)       # (H, 3H)
    bi_fused = jnp.concatenate([0.5 * (b_ir + b_hr), 0.5 * (b_iz + b_hz), b_in_])   # (3H,)

    # Pack everything except x and w2t into ONE (R, 128) f32 slab -> 3 input DMAs.
    R_VEC = 0                       # rows 0..3: h0, bi_fused, b_hn, b1
    R_WIH = 8
    R_WHH = R_WIH + _round_up(indim, 8)
    R_W1 = R_WHH + _round_up(H, 8)
    R_TOT = R_W1 + _round_up(H, 8)

    params = jnp.zeros((R_TOT, LANES), jnp.float32)
    params = params.at[R_VEC + 0, 0:H].set(h0[0])
    params = params.at[R_VEC + 1, 0:3 * H].set(bi_fused)
    params = params.at[R_VEC + 2, 0:H].set(b_hn)
    params = params.at[R_VEC + 3, 0:H].set(b1)
    params = params.at[R_WIH:R_WIH + indim, 0:3 * H].set(wih_fused)
    params = params.at[R_WHH:R_WHH + H, 0:3 * H].set(whh_fused)
    params = params.at[R_W1:R_W1 + H, 0:H].set(w1.T)

    w2t = jnp.zeros((H, out_pad), jnp.float32).at[:, :outdim].set(w2.T)

    def kernel(x_ref, p_ref, w2_ref, out_ref):
        # Loop-invariant VMEM->vreg loads, hoisted out of the recurrence.
        h0_v = p_ref[R_VEC + 0:R_VEC + 1, 0:H]                # (1, H)
        bi_v = p_ref[R_VEC + 1:R_VEC + 2, :]                  # (1, 128), zero past 3H
        bhn_v = p_ref[R_VEC + 2:R_VEC + 3, 0:H]               # (1, H)
        b1_v = p_ref[R_VEC + 3:R_VEC + 4, 0:H]                # (1, H)
        wih = p_ref[R_WIH:R_WIH + indim, :]                   # (indim, 128)
        whh = p_ref[R_WHH:R_WHH + H, :]                       # (H, 128)
        w1_v = p_ref[R_W1:R_W1 + H, 0:H]                      # (H, H)

        # Prologue: ONE fused input-to-hidden matmul for all timesteps & gates.
        gi = jnp.dot(x_ref[...], wih, preferred_element_type=jnp.float32) + bi_v   # (seq, 128)

        # Serial recurrence; hidden state carried in vregs, statically unrolled.
        # TODO(synk): hold `whh` stationary in the MXU (pltpu.matmul_push_rhs /
        #   matmul_acc_lhs / matmul_pop) to avoid re-pushing the RHS every step.
        # TODO(synk): switch to lax.fori_loop(unroll=True) if seq grows beyond ~64.
        h = h0_v
        for t in range(seq):
            gh = jnp.dot(h, whh, preferred_element_type=jnp.float32)    # (1, 128): one fused push
            # r & z in one EUP push: sigmoid(a) = 0.5*tanh(a/2)+0.5 (the /2 is
            # already folded into the r/z weight columns and biases).
            rz = 0.5 * jnp.tanh(gi[t:t + 1, 0:2 * H] + gh[:, 0:2 * H]) + 0.5
            r = rz[:, 0:H]
            z = rz[:, H:2 * H]
            n = jnp.tanh(gi[t:t + 1, 2 * H:3 * H] + r * (gh[:, 2 * H:3 * H] + bhn_v))
            h = n + z * (h - n)                                          # == (1-z)*n + z*h

        # MLP head: Linear(H,H)+ReLU, then Linear(H,out_pad) (no bias, zero-padded
        # columns) so the final store is lane-dense and unmasked.
        hid = jnp.maximum(
            jnp.dot(h, w1_v, preferred_element_type=jnp.float32) + b1_v, 0.0)
        out_ref[...] = jnp.dot(hid, w2_ref[...], preferred_element_type=jnp.float32)

    args = (x, params, w2t)

    flops = (2 * seq * indim * 3 * H                      # gi precompute
             + seq * (2 * H * 3 * H + 12 * H)             # recurrence
             + 2 * H * H + 2 * H * out_pad + 3 * H)       # MLP head
    transcendentals = seq * 3 * H
    bytes_accessed = int(sum(a.size * a.dtype.itemsize for a in args) + out_pad * 4)

    vmem_spec = pl.BlockSpec(memory_space=pltpu.MemorySpace.VMEM)
    out = pl.pallas_call(
        kernel,
        out_shape=jax.ShapeDtypeStruct((1, out_pad), jnp.float32),
        in_specs=[vmem_spec] * len(args),
        out_specs=vmem_spec,
        compiler_params=pltpu.CompilerParams(vmem_limit_bytes=1 * 1024 * 1024),
        cost_estimate=pl.CostEstimate(flops=flops,
                                      transcendentals=transcendentals,
                                      bytes_accessed=bytes_accessed),
    )(*args)
    # TODO(synk): the module is unbatched (single sequence); if multiple
    # independent sequences exist at a real call site, batch them on a leading
    # "parallel" grid axis to use the MXU width / both v7x TensorCores.
    return out[:, :outdim]


def gru_forward_ref(x, h0, w_ih, b_ih, w_hh, b_hh, w1, b1, w2):
    """Plain-JAX reference for correctness check (PyTorch nn.GRU math)."""
    H = h0.shape[1]
    h = h0[0]
    for t in range(x.shape[0]):
        gi = x[t] @ w_ih.T + b_ih
        gh = h @ w_hh.T + b_hh
        r = jax.nn.sigmoid(gi[0:H] + gh[0:H])
        z = jax.nn.sigmoid(gi[H:2 * H] + gh[H:2 * H])
        n = jnp.tanh(gi[2 * H:3 * H] + r * gh[2 * H:3 * H])
        h = (1.0 - z) * n + z * h
    hid = jnp.maximum(h @ w1.T + b1, 0.0)
    return (hid @ w2.T)[None, :]


def xavier_uniform(key, shape, gain=1.0):
    fan_out, fan_in = shape
    bound = gain * math.sqrt(6.0 / (fan_in + fan_out))
    return jax.random.uniform(key, shape, jnp.float32, -bound, bound)


if __name__ == "__main__":
    # Config implied by GRU.forward working: n_hidden=1 (hidden state (1, hidden)),
    # unbatched x, init='xavier_uniform', mlp_type='MLP', act='relu'.
    seq, indim, hidden, outdim = 8, 16, 32, 8

    key = jax.random.PRNGKey(0)
    ks = jax.random.split(key, 8)

    # nn.GRU default init: U(-k, k), k = 1/sqrt(hidden)
    k = 1.0 / math.sqrt(hidden)
    w_ih = jax.random.uniform(ks[0], (3 * hidden, indim), jnp.float32, -k, k)
    w_hh = jax.random.uniform(ks[1], (3 * hidden, hidden), jnp.float32, -k, k)
    b_ih = jax.random.uniform(ks[2], (3 * hidden,), jnp.float32, -k, k)
    b_hh = jax.random.uniform(ks[3], (3 * hidden,), jnp.float32, -k, k)

    # init_hidden('xavier_uniform') on empty(1, hidden)
    h0 = xavier_uniform(ks[4], (1, hidden))

    # MLP(hidden, outdim, hidden, n_hidden=1): Linear(H,H)+ReLU, Linear(H,outdim,bias=None)
    w1 = xavier_uniform(ks[5], (hidden, hidden), gain=1.0)
    b1 = jnp.zeros((hidden,), jnp.float32)
    w2 = xavier_uniform(ks[6], (outdim, hidden), gain=math.sqrt(3.0))

    x = jax.random.normal(ks[7], (seq, indim), jnp.float32)

    out = gru_forward(x, h0, w_ih, b_ih, w_hh, b_hh, w1, b1, w2)
    out = jax.block_until_ready(out)

    ref = gru_forward_ref(x, h0, w_ih, b_ih, w_hh, b_hh, w1, b1, w2)
    assert out.shape == (1, outdim)
    # Slightly loosened vs 1e-5: sigmoid-via-tanh and fused-matmul summation
    # orders round differently in f32 (identical in exact arithmetic).
    assert jnp.allclose(out, ref, atol=2e-5, rtol=2e-5), (out, ref)

    print("KERNEL_OK")
</pallas_src>

<mosaic_0001>
module attributes {stable_mosaic.version = 11 : i64} {
  func.func @kernel(%arg0: memref<8x16xf32, #tpu.memory_space<vmem>>, %arg1: memref<88x128xf32, #tpu.memory_space<vmem>>, %arg2: memref<32x128xf32, #tpu.memory_space<vmem>>, %arg3: memref<1x128xf32, #tpu.memory_space<vmem>>) attributes {dimension_semantics = [], scalar_prefetch = 0 : i64, scratch_operands = 0 : i64, tpu.core_type = #tpu.core_type<tc>} {
    %c0 = arith.constant 0 : index
    %c0_0 = arith.constant 0 : index
    %0 = vector.load %arg1[%c0, %c0_0] : memref<88x128xf32, #tpu.memory_space<vmem>>, vector<1x32xf32>
    %c1 = arith.constant 1 : index
    %c0_1 = arith.constant 0 : index
    %1 = vector.load %arg1[%c1, %c0_1] : memref<88x128xf32, #tpu.memory_space<vmem>>, vector<1x128xf32>
    %c2 = arith.constant 2 : index
    %c0_2 = arith.constant 0 : index
    %2 = vector.load %arg1[%c2, %c0_2] : memref<88x128xf32, #tpu.memory_space<vmem>>, vector<1x32xf32>
    %c3 = arith.constant 3 : index
    %c0_3 = arith.constant 0 : index
    %3 = vector.load %arg1[%c3, %c0_3] : memref<88x128xf32, #tpu.memory_space<vmem>>, vector<1x32xf32>
    %c8 = arith.constant 8 : index
    %c0_4 = arith.constant 0 : index
    %4 = vector.load %arg1[%c8, %c0_4] : memref<88x128xf32, #tpu.memory_space<vmem>>, vector<16x128xf32>
    %c24 = arith.constant 24 : index
    %c0_5 = arith.constant 0 : index
    %5 = vector.load %arg1[%c24, %c0_5] : memref<88x128xf32, #tpu.memory_space<vmem>>, vector<32x128xf32>
    %c56 = arith.constant 56 : index
    %c0_6 = arith.constant 0 : index
    %6 = vector.load %arg1[%c56, %c0_6] : memref<88x128xf32, #tpu.memory_space<vmem>>, vector<32x32xf32>
    %c0_7 = arith.constant 0 : index
    %c0_8 = arith.constant 0 : index
    %7 = vector.load %arg0[%c0_7, %c0_8] : memref<8x16xf32, #tpu.memory_space<vmem>>, vector<8x16xf32>
    %cst = arith.constant dense<0.000000e+00> : vector<8x128xf32>
    %8 = tpu.matmul %7, %4, %cst {dimension_numbers = #tpu.dot_dimension_numbers<[1], [0], [0], [1], [0, 0, 1, 1], [], []>} : vector<8x16xf32>, vector<16x128xf32>, vector<8x128xf32> -> vector<8x128xf32>
    %9 = vector.broadcast %1 : vector<1x128xf32> to vector<8x128xf32>
    %10 = arith.addf %8, %9 : vector<8x128xf32>
    %cst_9 = arith.constant dense<0.000000e+00> : vector<1x128xf32>
    %11 = tpu.matmul %0, %5, %cst_9 {dimension_numbers = #tpu.dot_dimension_numbers<[1], [0], [0], [1], [0, 0, 1, 1], [], []>} : vector<1x32xf32>, vector<32x128xf32>, vector<1x128xf32> -> vector<1x128xf32>
    %12 = vector.extract_strided_slice %10 {offsets = [0, 0], sizes = [1, 64], strides = [1, 1]} : vector<8x128xf32> to vector<1x64xf32>
    %13 = vector.extract_strided_slice %11 {offsets = [0, 0], sizes = [1, 64], strides = [1, 1]} : vector<1x128xf32> to vector<1x64xf32>
    %14 = arith.addf %12, %13 : vector<1x64xf32>
    %15 = math.tanh %14 : vector<1x64xf32>
    %cst_10 = arith.constant 5.000000e-01 : f32
    %16 = vector.broadcast %cst_10 : f32 to vector<1x64xf32>
    %17 = arith.mulf %16, %15 : vector<1x64xf32>
    %cst_11 = arith.constant 5.000000e-01 : f32
    %18 = vector.broadcast %cst_11 : f32 to vector<1x64xf32>
    %19 = arith.addf %17, %18 : vector<1x64xf32>
    %20 = vector.extract_strided_slice %19 {offsets = [0, 0], sizes = [1, 32], strides = [1, 1]} : vector<1x64xf32> to vector<1x32xf32>
    %21 = vector.extract_strided_slice %19 {offsets = [0, 32], sizes = [1, 32], strides = [1, 1]} : vector<1x64xf32> to vector<1x32xf32>
    %22 = vector.extract_strided_slice %10 {offsets = [0, 64], sizes = [1, 32], strides = [1, 1]} : vector<8x128xf32> to vector<1x32xf32>
    %23 = vector.extract_strided_slice %11 {offsets = [0, 64], sizes = [1, 32], strides = [1, 1]} : vector<1x128xf32> to vector<1x32xf32>
    %24 = arith.addf %23, %2 : vector<1x32xf32>
    %25 = arith.mulf %20, %24 : vector<1x32xf32>
    %26 = arith.addf %22, %25 : vector<1x32xf32>
    %27 = math.tanh %26 : vector<1x32xf32>
    %28 = arith.subf %0, %27 : vector<1x32xf32>
    %29 = arith.mulf %21, %28 : vector<1x32xf32>
    %30 = arith.addf %27, %29 : vector<1x32xf32>
    %cst_12 = arith.constant dense<0.000000e+00> : vector<1x128xf32>
    %31 = tpu.matmul %30, %5, %cst_12 {dimension_numbers = #tpu.dot_dimension_numbers<[1], [0], [0], [1], [0, 0, 1, 1], [], []>} : vector<1x32xf32>, vector<32x128xf32>, vector<1x128xf32> -> vector<1x128xf32>
    %32 = vector.extract_strided_slice %10 {offsets = [1, 0], sizes = [1, 64], strides = [1, 1]} : vector<8x128xf32> to vector<1x64xf32>
    %33 = vector.extract_strided_slice %31 {offsets = [0, 0], sizes = [1, 64], strides = [1, 1]} : vector<1x128xf32> to vector<1x64xf32>
    %34 = arith.addf %32, %33 : vector<1x64xf32>
    %35 = math.tanh %34 : vector<1x64xf32>
    %cst_13 = arith.constant 5.000000e-01 : f32
    %36 = vector.broadcast %cst_13 : f32 to vector<1x64xf32>
    %37 = arith.mulf %36, %35 : vector<1x64xf32>
    %cst_14 = arith.constant 5.000000e-01 : f32
    %38 = vector.broadcast %cst_14 : f32 to vector<1x64xf32>
    %39 = arith.addf %37, %38 : vector<1x64xf32>
    %40 = vector.extract_strided_slice %39 {offsets = [0, 0], sizes = [1, 32], strides = [1, 1]} : vector<1x64xf32> to vector<1x32xf32>
    %41 = vector.extract_strided_slice %39 {offsets = [0, 32], sizes = [1, 32], strides = [1, 1]} : vector<1x64xf32> to vector<1x32xf32>
    %42 = vector.extract_strided_slice %10 {offsets = [1, 64], sizes = [1, 32], strides = [1, 1]} : vector<8x128xf32> to vector<1x32xf32>
    %43 = vector.extract_strided_slice %31 {offsets = [0, 64], sizes = [1, 32], strides = [1, 1]} : vector<1x128xf32> to vector<1x32xf32>
    %44 = arith.addf %43, %2 : vector<1x32xf32>
    %45 = arith.mulf %40, %44 : vector<1x32xf32>
    %46 = arith.addf %42, %45 : vector<1x32xf32>
    %47 = math.tanh %46 : vector<1x32xf32>
    %48 = arith.subf %30, %47 : vector<1x32xf32>
    %49 = arith.mulf %41, %48 : vector<1x32xf32>
    %50 = arith.addf %47, %49 : vector<1x32xf32>
    %cst_15 = arith.constant dense<0.000000e+00> : vector<1x128xf32>
    %51 = tpu.matmul %50, %5, %cst_15 {dimension_numbers = #tpu.dot_dimension_numbers<[1], [0], [0], [1], [0, 0, 1, 1], [], []>} : vector<1x32xf32>, vector<32x128xf32>, vector<1x128xf32> -> vector<1x128xf32>
    %52 = vector.extract_strided_slice %10 {offsets = [2, 0], sizes = [1, 64], strides = [1, 1]} : vector<8x128xf32> to vector<1x64xf32>
    %53 = vector.extract_strided_slice %51 {offsets = [0, 0], sizes = [1, 64], strides = [1, 1]} : vector<1x128xf32> to vector<1x64xf32>
    %54 = arith.addf %52, %53 : vector<1x64xf32>
    %55 = math.tanh %54 : vector<1x64xf32>
    %cst_16 = arith.constant 5.000000e-01 : f32
    %56 = vector.broadcast %cst_16 : f32 to vector<1x64xf32>
    %57 = arith.mulf %56, %55 : vector<1x64xf32>
    %cst_17 = arith.constant 5.000000e-01 : f32
    %58 = vector.broadcast %cst_17 : f32 to vector<1x64xf32>
    %59 = arith.addf %57, %58 : vector<1x64xf32>
    %60 = vector.extract_strided_slice %59 {offsets = [0, 0], sizes = [1, 32], strides = [1, 1]} : vector<1x64xf32> to vector<1x32xf32>
    %61 = vector.extract_strided_slice %59 {offsets = [0, 32], sizes = [1, 32], strides = [1, 1]} : vector<1x64xf32> to vector<1x32xf32>
    %62 = vector.extract_strided_slice %10 {offsets = [2, 64], sizes = [1, 32], strides = [1, 1]} : vector<8x128xf32> to vector<1x32xf32>
    %63 = vector.extract_strided_slice %51 {offsets = [0, 64], sizes = [1, 32], strides = [1, 1]} : vector<1x128xf32> to vector<1x32xf32>
    %64 = arith.addf %63, %2 : vector<1x32xf32>
    %65 = arith.mulf %60, %64 : vector<1x32xf32>
    %66 = arith.addf %62, %65 : vector<1x32xf32>
    %67 = math.tanh %66 : vector<1x32xf32>
    %68 = arith.subf %50, %67 : vector<1x32xf32>
    %69 = arith.mulf %61, %68 : vector<1x32xf32>
    %70 = arith.addf %67, %69 : vector<1x32xf32>
    %cst_18 = arith.constant dense<0.000000e+00> : vector<1x128xf32>
    %71 = tpu.matmul %70, %5, %cst_18 {dimension_numbers = #tpu.dot_dimension_numbers<[1], [0], [0], [1], [0, 0, 1, 1], [], []>} : vector<1x32xf32>, vector<32x128xf32>, vector<1x128xf32> -> vector<1x128xf32>
    %72 = vector.extract_strided_slice %10 {offsets = [3, 0], sizes = [1, 64], strides = [1, 1]} : vector<8x128xf32> to vector<1x64xf32>
    %73 = vector.extract_strided_slice %71 {offsets = [0, 0], sizes = [1, 64], strides = [1, 1]} : vector<1x128xf32> to vector<1x64xf32>
    %74 = arith.addf %72, %73 : vector<1x64xf32>
    %75 = math.tanh %74 : vector<1x64xf32>
    %cst_19 = arith.constant 5.000000e-01 : f32
    %76 = vector.broadcast %cst_19 : f32 to vector<1x64xf32>
    %77 = arith.mulf %76, %75 : vector<1x64xf32>
    %cst_20 = arith.constant 5.000000e-01 : f32
    %78 = vector.broadcast %cst_20 : f32 to vector<1x64xf32>
    %79 = arith.addf %77, %78 : vector<1x64xf32>
    %80 = vector.extract_strided_slice %79 {offsets = [0, 0], sizes = [1, 32], strides = [1, 1]} : vector<1x64xf32> to vector<1x32xf32>
    %81 = vector.extract_strided_slice %79 {offsets = [0, 32], sizes = [1, 32], strides = [1, 1]} : vector<1x64xf32> to vector<1x32xf32>
    %82 = vector.extract_strided_slice %10 {offsets = [3, 64], sizes = [1, 32], strides = [1, 1]} : vector<8x128xf32> to vector<1x32xf32>
    %83 = vector.extract_strided_slice %71 {offsets = [0, 64], sizes = [1, 32], strides = [1, 1]} : vector<1x128xf32> to vector<1x32xf32>
    %84 = arith.addf %83, %2 : vector<1x32xf32>
    %85 = arith.mulf %80, %84 : vector<1x32xf32>
    %86 = arith.addf %82, %85 : vector<1x32xf32>
    %87 = math.tanh %86 : vector<1x32xf32>
    %88 = arith.subf %70, %87 : vector<1x32xf32>
    %89 = arith.mulf %81, %88 : vector<1x32xf32>
    %90 = arith.addf %87, %89 : vector<1x32xf32>
    %cst_21 = arith.constant dense<0.000000e+00> : vector<1x128xf32>
    %91 = tpu.matmul %90, %5, %cst_21 {dimension_numbers = #tpu.dot_dimension_numbers<[1], [0], [0], [1], [0, 0, 1, 1], [], []>} : vector<1x32xf32>, vector<32x128xf32>, vector<1x128xf32> -> vector<1x128xf32>
    %92 = vector.extract_strided_slice %10 {offsets = [4, 0], sizes = [1, 64], strides = [1, 1]} : vector<8x128xf32> to vector<1x64xf32>
    %93 = vector.extract_strided_slice %91 {offsets = [0, 0], sizes = [1, 64], strides = [1, 1]} : vector<1x128xf32> to vector<1x64xf32>
    %94 = arith.addf %92, %93 : vector<1x64xf32>
    %95 = math.tanh %94 : vector<1x64xf32>
    %cst_22 = arith.constant 5.000000e-01 : f32
    %96 = vector.broadcast %cst_22 : f32 to vector<1x64xf32>
    %97 = arith.mulf %96, %95 : vector<1x64xf32>
    %cst_23 = arith.constant 5.000000e-01 : f32
    %98 = vector.broadcast %cst_23 : f32 to vector<1x64xf32>
    %99 = arith.addf %97, %98 : vector<1x64xf32>
    %100 = vector.extract_strided_slice %99 {offsets = [0, 0], sizes = [1, 32], strides = [1, 1]} : vector<1x64xf32> to vector<1x32xf32>
    %101 = vector.extract_strided_slice %99 {offsets = [0, 32], sizes = [1, 32], strides = [1, 1]} : vector<1x64xf32> to vector<1x32xf32>
    %102 = vector.extract_strided_slice %10 {offsets = [4, 64], sizes = [1, 32], strides = [1, 1]} : vector<8x128xf32> to vector<1x32xf32>
    %103 = vector.extract_strided_slice %91 {offsets = [0, 64], sizes = [1, 32], strides = [1, 1]} : vector<1x128xf32> to vector<1x32xf32>
    %104 = arith.addf %103, %2 : vector<1x32xf32>
    %105 = arith.mulf %100, %104 : vector<1x32xf32>
    %106 = arith.addf %102, %105 : vector<1x32xf32>
    %107 = math.tanh %106 : vector<1x32xf32>
    %108 = arith.subf %90, %107 : vector<1x32xf32>
    %109 = arith.mulf %101, %108 : vector<1x32xf32>
    %110 = arith.addf %107, %109 : vector<1x32xf32>
    %cst_24 = arith.constant dense<0.000000e+00> : vector<1x128xf32>
    %111 = tpu.matmul %110, %5, %cst_24 {dimension_numbers = #tpu.dot_dimension_numbers<[1], [0], [0], [1], [0, 0, 1, 1], [], []>} : vector<1x32xf32>, vector<32x128xf32>, vector<1x128xf32> -> vector<1x128xf32>
    %112 = vector.extract_strided_slice %10 {offsets = [5, 0], sizes = [1, 64], strides = [1, 1]} : vector<8x128xf32> to vector<1x64xf32>
    %113 = vector.extract_strided_slice %111 {offsets = [0, 0], sizes = [1, 64], strides = [1, 1]} : vector<1x128xf32> to vector<1x64xf32>
    %114 = arith.addf %112, %113 : vector<1x64xf32>
    %115 = math.tanh %114 : vector<1x64xf32>
    %cst_25 = arith.constant 5.000000e-01 : f32
    %116 = vector.broadcast %cst_25 : f32 to vector<1x64xf32>
    %117 = arith.mulf %116, %115 : vector<1x64xf32>
    %cst_26 = arith.constant 5.000000e-01 : f32
    %118 = vector.broadcast %cst_26 : f32 to vector<1x64xf32>
    %119 = arith.addf %117, %118 : vector<1x64xf32>
    %120 = vector.extract_strided_slice %119 {offsets = [0, 0], sizes = [1, 32], strides = [1, 1]} : vector<1x64xf32> to vector<1x32xf32>
    %121 = vector.extract_strided_slice %119 {offsets = [0, 32], sizes = [1, 32], strides = [1, 1]} : vector<1x64xf32> to vector<1x32xf32>
    %122 = vector.extract_strided_slice %10 {offsets = [5, 64], sizes = [1, 32], strides = [1, 1]} : vector<8x128xf32> to vector<1x32xf32>
    %123 = vector.extract_strided_slice %111 {offsets = [0, 64], sizes = [1, 32], strides = [1, 1]} : vector<1x128xf32> to vector<1x32xf32>
    %124 = arith.addf %123, %2 : vector<1x32xf32>
    %125 = arith.mulf %120, %124 : vector<1x32xf32>
    %126 = arith.addf %122, %125 : vector<1x32xf32>
    %127 = math.tanh %126 : vector<1x32xf32>
    %128 = arith.subf %110, %127 : vector<1x32xf32>
    %129 = arith.mulf %121, %128 : vector<1x32xf32>
    %130 = arith.addf %127, %129 : vector<1x32xf32>
    %cst_27 = arith.constant dense<0.000000e+00> : vector<1x128xf32>
    %131 = tpu.matmul %130, %5, %cst_27 {dimension_numbers = #tpu.dot_dimension_numbers<[1], [0], [0], [1], [0, 0, 1, 1], [], []>} : vector<1x32xf32>, vector<32x128xf32>, vector<1x128xf32> -> vector<1x128xf32>
    %132 = vector.extract_strided_slice %10 {offsets = [6, 0], sizes = [1, 64], strides = [1, 1]} : vector<8x128xf32> to vector<1x64xf32>
    %133 = vector.extract_strided_slice %131 {offsets = [0, 0], sizes = [1, 64], strides = [1, 1]} : vector<1x128xf32> to vector<1x64xf32>
    %134 = arith.addf %132, %133 : vector<1x64xf32>
    %135 = math.tanh %134 : vector<1x64xf32>
    %cst_28 = arith.constant 5.000000e-01 : f32
    %136 = vector.broadcast %cst_28 : f32 to vector<1x64xf32>
    %137 = arith.mulf %136, %135 : vector<1x64xf32>
    %cst_29 = arith.constant 5.000000e-01 : f32
    %138 = vector.broadcast %cst_29 : f32 to vector<1x64xf32>
    %139 = arith.addf %137, %138 : vector<1x64xf32>
    %140 = vector.extract_strided_slice %139 {offsets = [0, 0], sizes = [1, 32], strides = [1, 1]} : vector<1x64xf32> to vector<1x32xf32>
    %141 = vector.extract_strided_slice %139 {offsets = [0, 32], sizes = [1, 32], strides = [1, 1]} : vector<1x64xf32> to vector<1x32xf32>
    %142 = vector.extract_strided_slice %10 {offsets = [6, 64], sizes = [1, 32], strides = [1, 1]} : vector<8x128xf32> to vector<1x32xf32>
    %143 = vector.extract_strided_slice %131 {offsets = [0, 64], sizes = [1, 32], strides = [1, 1]} : vector<1x128xf32> to vector<1x32xf32>
    %144 = arith.addf %143, %2 : vector<1x32xf32>
    %145 = arith.mulf %140, %144 : vector<1x32xf32>
    %146 = arith.addf %142, %145 : vector<1x32xf32>
    %147 = math.tanh %146 : vector<1x32xf32>
    %148 = arith.subf %130, %147 : vector<1x32xf32>
    %149 = arith.mulf %141, %148 : vector<1x32xf32>
    %150 = arith.addf %147, %149 : vector<1x32xf32>
    %cst_30 = arith.constant dense<0.000000e+00> : vector<1x128xf32>
    %151 = tpu.matmul %150, %5, %cst_30 {dimension_numbers = #tpu.dot_dimension_numbers<[1], [0], [0], [1], [0, 0, 1, 1], [], []>} : vector<1x32xf32>, vector<32x128xf32>, vector<1x128xf32> -> vector<1x128xf32>
    %152 = vector.extract_strided_slice %10 {offsets = [7, 0], sizes = [1, 64], strides = [1, 1]} : vector<8x128xf32> to vector<1x64xf32>
    %153 = vector.extract_strided_slice %151 {offsets = [0, 0], sizes = [1, 64], strides = [1, 1]} : vector<1x128xf32> to vector<1x64xf32>
    %154 = arith.addf %152, %153 : vector<1x64xf32>
    %155 = math.tanh %154 : vector<1x64xf32>
    %cst_31 = arith.constant 5.000000e-01 : f32
    %156 = vector.broadcast %cst_31 : f32 to vector<1x64xf32>
    %157 = arith.mulf %156, %155 : vector<1x64xf32>
    %cst_32 = arith.constant 5.000000e-01 : f32
    %158 = vector.broadcast %cst_32 : f32 to vector<1x64xf32>
    %159 = arith.addf %157, %158 : vector<1x64xf32>
    %160 = vector.extract_strided_slice %159 {offsets = [0, 0], sizes = [1, 32], strides = [1, 1]} : vector<1x64xf32> to vector<1x32xf32>
    %161 = vector.extract_strided_slice %159 {offsets = [0, 32], sizes = [1, 32], strides = [1, 1]} : vector<1x64xf32> to vector<1x32xf32>
    %162 = vector.extract_strided_slice %10 {offsets = [7, 64], sizes = [1, 32], strides = [1, 1]} : vector<8x128xf32> to vector<1x32xf32>
    %163 = vector.extract_strided_slice %151 {offsets = [0, 64], sizes = [1, 32], strides = [1, 1]} : vector<1x128xf32> to vector<1x32xf32>
    %164 = arith.addf %163, %2 : vector<1x32xf32>
    %165 = arith.mulf %160, %164 : vector<1x32xf32>
    %166 = arith.addf %162, %165 : vector<1x32xf32>
    %167 = math.tanh %166 : vector<1x32xf32>
    %168 = arith.subf %150, %167 : vector<1x32xf32>
    %169 = arith.mulf %161, %168 : vector<1x32xf32>
    %170 = arith.addf %167, %169 : vector<1x32xf32>
    %cst_33 = arith.constant dense<0.000000e+00> : vector<1x32xf32>
    %171 = tpu.matmul %170, %6, %cst_33 {dimension_numbers = #tpu.dot_dimension_numbers<[1], [0], [0], [1], [0, 0, 1, 1], [], []>} : vector<1x32xf32>, vector<32x32xf32>, vector<1x32xf32> -> vector<1x32xf32>
    %172 = arith.addf %171, %3 : vector<1x32xf32>
    %cst_34 = arith.constant 0.000000e+00 : f32
    %173 = vector.broadcast %cst_34 : f32 to vector<1x32xf32>
    %174 = arith.maximumf %172, %173 : vector<1x32xf32>
    %c0_35 = arith.constant 0 : index
    %c0_36 = arith.constant 0 : index
    %175 = vector.load %arg2[%c0_35, %c0_36] : memref<32x128xf32, #tpu.memory_space<vmem>>, vector<32x128xf32>
    %cst_37 = arith.constant dense<0.000000e+00> : vector<1x128xf32>
    %176 = tpu.matmul %174, %175, %cst_37 {dimension_numbers = #tpu.dot_dimension_numbers<[1], [0], [0], [1], [0, 0, 1, 1], [], []>} : vector<1x32xf32>, vector<32x128xf32>, vector<1x128xf32> -> vector<1x128xf32>
    %c0_38 = arith.constant 0 : index
    %c0_39 = arith.constant 0 : index
    %177 = vector.load %arg3[%c0_38, %c0_39] : memref<1x128xf32, #tpu.memory_space<vmem>>, vector<1x128xf32>
    tpu.vector_store %arg3[%c0_38, %c0_39], %176 {strides = array<i32>} : memref<1x128xf32, #tpu.memory_space<vmem>>, vector<1x128xf32>,
    return
  }
}

</mosaic_0001>

<bundles_post_ra>
// kernel: tpu_custom_call.1
= control target key start
LH: loop header
LB: loop body
LE: loop exit
PB: predicated region body
PF: predicated region fallthrough
CT: control target
= control target key end

     0   :  { %8 = vsyncpa [#allocation3], 0  ;;  %s1815_s0 = inlined_call_operand.hbm [shape: f32[8,16], index: 0, kind: input, shape index: {}]   ;;  %s1816_s1 = inlined_call_operand.hbm [shape: f32[88,128], index: 1, kind: input, shape index: {}]   ;;  %s1817_s2 = inlined_call_operand.hbm [shape: f32[32,128], index: 2, kind: input, shape index: {}]   ;;  %s1818_s3 = inlined_call_operand.hbm [shape: f32[1,128], index: 3, kind: output, shape index: {}]  }
   0x1   :  { %9 = vsyncpa [#allocation6], 0 }
   0x2   :  { %10 = vsyncpa [#allocation4], 0  ;;  %s1586_s12 = smov [#allocation5]   ;;  %s1492_s16 = scalar_lea.hbm %s1816_s1, 1408 }
   0x3   :  { %s26_s13 = sshll.u32 %s1586_s12, 4  ;;  %p1493_p0 = scmp.ne.s32.totalorder %s1816_s1, %s1492_s16  ;;  %s27_s13 = int_to_ptr.vmem [resolvable:$true] %s26_s13 }
   0x4   :  { %p1496_p1 = scmp.lt.u32.totalorder %s1492_s16, %s1816_s1 }
   0x6   :  { %p1498_p2 = pnand %p1496_p1, %p1493_p0 }
   0x8   :  { %1501 = shalt.err (!%p1498_p2)
}
   0x9   :  { %s1502_s21 = scalar_lea.vmem %s27_s13, 1408  ;;  %p1507_p4 = scmp.lt.s32.totalorder %s27_s13, %s27_s13 }
   0xa   :  { %p1503_p3 = scmp.ne.s32.totalorder %s27_s13, %s1502_s21  ;;  %p1508_p5 = scmp.lt.s32.totalorder %s1502_s21, %s1502_s21 }
   0xc   :  { %p1509_p6 = por %p1508_p5, %p1507_p4 }
   0xe   :  { %p1510_p7 = pnand %p1509_p6, %p1503_p3 }
  0x10   :  { %1513 = shalt.err (!%p1510_p7)
}
  0x11   :  { %s1587_s22 = smov 128   ;;  %s1588_s23 = smov 8  }
  0x12   :  { %32 = dma.hbm_to_vmem [thread:$0]  %s1816_s1, 1408, %s27_s13, [#allocation6], %s1587_s22, %s1587_s22, %s1588_s23  }
  0x13   :  { %s1589_s26 = smov [#allocation2]   ;;  %s1590_s28 = smov [#allocation7]  }
  0x14   :  { %s17_s27 = sshll.u32 %s1589_s26, 4  ;;  %s38_s29 = sshll.u32 %s1590_s28, 4  ;;  %s18_s27 = int_to_ptr.vmem [resolvable:$true] %s17_s27  ;;  %s39_s29 = int_to_ptr.vmem [resolvable:$true] %s38_s29 }
  0x15   :  { %s1514_s5 = scalar_lea.hbm %s1815_s0, 128 }
  0x16   :  { %p1515_p8 = scmp.ne.s32.totalorder %s1815_s0, %s1514_s5  ;;  %p1518_p9 = scmp.lt.u32.totalorder %s1514_s5, %s1815_s0 }
  0x18   :  { %p1520_p10 = pnand %p1518_p9, %p1515_p8 }
  0x1a   :  { %1523 = shalt.err (!%p1520_p10)
}
  0x1b   :  { %s1524_s1 = scalar_lea.vmem %s18_s27, 128  ;;  %p1529_p12 = scmp.lt.s32.totalorder %s18_s27, %s18_s27 }
  0x1c   :  { %p1525_p11 = scmp.ne.s32.totalorder %s18_s27, %s1524_s1  ;;  %p1530_p13 = scmp.lt.s32.totalorder %s1524_s1, %s1524_s1 }
  0x1e   :  { %p1531_p0 = por %p1530_p13, %p1529_p12 }
  0x20   :  { %p1532_p1 = pnand %p1531_p0, %p1525_p11 }
  0x22   :  { %1535 = shalt.err (!%p1532_p1)
}
  0x23   :  { %20 = dma.hbm_to_vmem [thread:$0]  %s1815_s0, 128, %s18_s27, [#allocation3]  }
  0x24   :  { %s1536_s14 = scalar_lea.hbm %s1817_s2, 512 }
  0x25   :  { %p1537_p2 = scmp.ne.s32.totalorder %s1817_s2, %s1536_s14  ;;  %p1540_p3 = scmp.lt.u32.totalorder %s1536_s14, %s1817_s2 }
  0x27   :  { %p1542_p4 = pnand %p1540_p3, %p1537_p2 }
  0x29   :  { %1545 = shalt.err (!%p1542_p4)
}
  0x2a   :  { %s1546_s19 = scalar_lea.vmem %s39_s29, 512  ;;  %p1551_p6 = scmp.lt.s32.totalorder %s39_s29, %s39_s29 }
  0x2b   :  { %p1547_p5 = scmp.ne.s32.totalorder %s39_s29, %s1546_s19  ;;  %p1552_p7 = scmp.lt.s32.totalorder %s1546_s19, %s1546_s19 }
  0x2d   :  { %p1553_p8 = por %p1552_p7, %p1551_p6 }
  0x2f   :  { %p1554_p9 = pnand %p1553_p8, %p1547_p5 }
  0x31   :  { %1557 = shalt.err (!%p1554_p9)
}
  0x32   :  { %44 = dma.hbm_to_vmem [thread:$0]  %s1817_s2, 512, %s39_s29, [#allocation6], %s1587_s22, %s1587_s22, %s1588_s23  }
  0x33   :  { %1580 = dma.done.wait [#allocation3], 128  }
  0x34   :  { %1581 = vsyncadd [#allocation3], 4294967168 }
  0x35   :  { %1582 = dma.done.wait [#allocation6], 1920  }
  0x36   :  { %1583 = vsyncadd [#allocation6], 4294965376  ;;  %v1591_v0 = vmov 0.0|0.0   ;;  %vm1592_vm0 = vmmov 0   ;;  %v1593_v1 = vmov 0.0   ;;  %v60_v2 = vld [vmem:[#allocation5 + $0x18] sm:$0xff] }
  0x37   :  { %1388 = vmatprep.subr.bf16.mxu1 %v1591_v0  ;;  %1385 = vmatprep.subr.bf16.mxu0 %v1591_v0  ;;  %v61_v3 = vld [vmem:[#allocation5 + $0x20] sm:$0xff]  ;;  %v58_v4 = vld [vmem:[#allocation5 + $0x8] sm:$0xff]  ;;  %v59_v6 = vld [vmem:[#allocation5 + $0x10] sm:$0xff]  ;;  %s1594_s2 = smov 64   ;;  %vm73_vm1 = vcmask 130048   ;;  %vm147_vm2 = vcmask 261120  }
  0x38   :  { %1272 = vmatprep.mubr.msk.f32.mxu0 %vm1592_vm0, %v1593_v1  ;;  %1283 = vmatprep.mubr.msk.f32.mxu1 %vm1592_vm0, %v1593_v1  ;;  %v1666_v5 = vpack.c.bf16 %v61_v3, %v60_v2  ;;  %v62_v7 = vld [vmem:[#allocation5 + $0x28] sm:$0xff]  ;;  %v63_v8 = vld [vmem:[#allocation5 + $0x30] sm:$0xff]  ;;  %v1386_v9 = vpack.c.bf16 %v59_v6, %v58_v4  ;;  %v56_v10 = vld [vmem:[#allocation5 + $0x2] sm:$0x1]  ;;  %s1595_s21 = smov 32   ;;  %s1596_s22 = smov 96  }
  0x39   :  { %v1669_v11 = vpack.c.bf16 %v63_v8, %v62_v7  ;;  %226 = vrot.lane.b32.xlu0 %v56_v10, %s1594_s2  ;;  %v68_v12 = vld [vmem:[#allocation2] sm:$0xff]  ;;  %v54_v13 = vld [vmem:[#allocation5] sm:$0x1]  ;;  %v1203_v20 = vld [vmem:[#allocation5 + $0x1] ss:$0 sm:$0xff]  ;;  %s1597_s23 = smov [#allocation8]  }
  0x3a   :  { %1390 = vmatpush3.bf16.msra.mxu1 %v1666_v5  ;;  %1387 = vmatpush3.bf16.msra.mxu0 %v1386_v9  ;;  %s1193_s24 = sshll.u32 %s1597_s23, 4  ;;  %s1194_s24 = int_to_ptr.vmem [resolvable:$true] %s1193_s24 }
  0x3b   :  { %1391 = vmatprep.subr.bf16.mxu1 %v1591_v0  ;;  %1394 = vmatprep.subr.bf16.mxu0 %v1591_v0  ;;  %s1558_s25 = scalar_lea.vmem %s1194_s24, 16  ;;  %s1562_s26 = scalar_lea.vmem %s1194_s24, 32 }
  0x3c   :  { %p1559_p10 = scmp.ne.s32.totalorder %s1194_s24, %s1558_s25  ;;  %p1563_p11 = scmp.lt.s32.totalorder %s1194_s24, %s1194_s24 }
  0x3d   :  { %1273 = vmatmul.mubr.msk.f32.vlgmr.msra.gmra.mrb[0].mxu0 %vm73_vm1, %v68_v12  ;;  %p1564_p12 = scmp.lt.s32.totalorder %s1562_s26, %s1558_s25 }
  0x3e   :  { %1393 = vmatpush3.bf16.msra.mxu1 %v1669_v11  ;;  %1396 = vmatpush3.bf16.msra.mxu0 %v1666_v5 }
  0x3f   :  { %1294 = vmatprep.mubr.msk.f32.mxu0 %vm1592_vm0, %v1593_v1  ;;  %1397 = vmatprep.subr.bf16.mxu0 %v1591_v0  ;;  %p1565_p13 = por %p1564_p12, %p1563_p11 }
  0x40   :  { %1400 = vmatprep.subr.bf16.mxu1 %v1591_v0 }
  0x41   :  { %1284 = vmatmul.mubr.msk.f32.vlgmr.msra.gmra.mrb[0].mxu1 %vm147_vm2, %v54_v13  ;;  %p1566_p0 = pnand %p1565_p13, %p1559_p10 }
  0x42   :  { %1402 = vmatpush3.bf16.msra.mxu1 %v1666_v5  ;;  %1305 = vmatprep.mubr.msk.f32.mxu1 %vm1592_vm0, %v1593_v1 }
  0x43   :  { %1399 = vmatpush3.bf16.msra.mxu0 %v1669_v11  ;;  %1403 = vmatprep.subr.bf16.mxu1 %v1591_v0 }
  0x44   :  { %1406 = vmatprep.subr.bf16.mxu0 %v1591_v0 }
  0x46   :  { %1405 = vmatpush3.bf16.msra.mxu1 %v1669_v11 }
  0x47   :  { %1412 = vmatprep.subr.bf16.mxu1 %v1591_v0 }
  0xab   :  { %v1689_v15 = vpop.permute.xlu0 %226 }
 0x110   :  { %v143_v14 = vpop.f32.mrb[0].mxu0 }
 0x111   :  { %v1274_v16 = vpop.f32.mrb[1].mxu0  ;;  %v1693_v21 = vadd.f32 %v1203_v20, %v143_v14 }
 0x114   :  { %v217_v17 = vpop.f32.mrb[0].mxu1 }
 0x115   :  { %v229_v18 = vadd.f32 %v1689_v15, %v217_v17  ;;  %v1285_v19 = vpop.f32.mrb[1].mxu1  ;;  %v221_v22 = vadd.f32 %v217_v17, %v1693_v21 }
 0x117   :  { %231 = vrot.lane.b32.xlu0 %v229_v18, %s1594_s2  ;;  %1460 = vtanh.f32 %v221_v22 }
 0x121   :  { %v1461_v23 = vpop.eup %1460 }
 0x122   :  { %v223_v24 = vmul.f32 0.5, %v1461_v23 }
 0x124   :  { %v224_v25 = vadd.f32 0.5, %v223_v24 }
 0x189   :  { %v232_v26 = vpop.permute.xlu0 %231 }
 0x18a   :  { %v234_v27 = vmul.f32 %v232_v26, %v224_v25 }
 0x18c   :  { %236 = vrot.lane.b32.xlu1 %v234_v27, %s1594_s2 }
 0x1fe   :  { %v237_v28 = vpop.permute.xlu1 %236 }
 0x1ff   :  { %v239_v29 = vadd.f32 %v237_v28, %v1693_v21 }
 0x201   :  { %1462 = vtanh.f32 %v239_v29 }
 0x20b   :  { %v1463_v30 = vpop.eup %1462 }
 0x20c   :  { %242 = vrot.lane.b32.xlu1 %v1463_v30, %s1594_s2 }
 0x27e   :  { %v243_v31 = vpop.permute.xlu1 %242 }
 0x27f   :  { %v245_v32 = vsub.f32 %v54_v13, %v243_v31 }
 0x281   :  { %247 = vrot.lane.b32.xlu0 %v245_v32, %s1595_s21 }
 0x2f3   :  { %v248_v33 = vpop.permute.xlu0 %247 }
 0x2f4   :  { %v250_v34 = vmul.f32 %v248_v33, %v224_v25 }
 0x2f6   :  { %252 = vrot.lane.b32.xlu1 %v250_v34, %s1595_s21 }
 0x368   :  { %v253_v35 = vpop.permute.xlu1 %252 }
 0x369   :  { %v255_v36 = vadd.f32 %v1463_v30, %v253_v35 }
 0x36b   :  { %257 = vrot.lane.b32.xlu0 %v255_v36, %s1594_s2 }
 0x3dd   :  { %v258_v37 = vpop.permute.xlu0 %257 }
 0x3de   :  { %1295 = vmatmul.mubr.msk.f32.vlgmr.msra.gmra.mrb[2].mxu0 %vm147_vm2, %v258_v37 }
 0x3df   :  { %1408 = vmatpush3.bf16.msra.mxu0 %v1666_v5  ;;  %1316 = vmatprep.mubr.msk.f32.mxu0 %vm1592_vm0, %v1593_v1 }
 0x3e0   :  { %1409 = vmatprep.subr.bf16.mxu0 %v1591_v0 }
 0x3e3   :  { %1411 = vmatpush3.bf16.msra.mxu0 %v1669_v11 }
 0x3e4   :  { %1418 = vmatprep.subr.bf16.mxu0 %v1591_v0 }
 0x4b1   :  { %v327_v38 = vpop.f32.mrb[2].mxu0 }
 0x4b2   :  { %v338_v39 = vadd.f32 %v327_v38, %v1689_v15  ;;  %v1296_v40 = vpop.f32.mrb[3].mxu0  ;;  %v332_v42 = vrot.slane %v327_v38, 7 }
 0x4b4   :  { %v340_v41 = vrot.slane %v338_v39, 7  ;;  %v334_v43 = vadd.f32 %v332_v42, %v1693_v21 }
 0x4b6   :  { %341 = vrot.lane.b32.xlu1 %v340_v41, %s1594_s2  ;;  %1464 = vtanh.f32 %v334_v43 }
 0x4c0   :  { %v1465_v44 = vpop.eup %1464 }
 0x4c1   :  { %v336_v45 = vmul.f32 0.5, %v1465_v44 }
 0x4c3   :  { %v337_v46 = vadd.f32 0.5, %v336_v45 }
 0x528   :  { %v342_v47 = vpop.permute.xlu1 %341 }
 0x529   :  { %v344_v48 = vmul.f32 %v342_v47, %v337_v46 }
 0x52b   :  { %346 = vrot.lane.b32.xlu0 %v344_v48, %s1594_s2 }
 0x59d   :  { %v347_v49 = vpop.permute.xlu0 %346 }
 0x59e   :  { %v349_v50 = vadd.f32 %v347_v49, %v1693_v21 }
 0x5a0   :  { %1466 = vtanh.f32 %v349_v50 }
 0x5aa   :  { %v1467_v51 = vpop.eup %1466 }
 0x5ab   :  { %v352_v52 = vrot.slane %v1467_v51, 1 }
 0x5ad   :  { %v354_v53 = vsub.f32 %v255_v36, %v352_v52 }
 0x5af   :  { %v356_v54 = vrot.slane %v354_v53, 7 }
 0x5b1   :  { %357 = vrot.lane.b32.xlu1 %v356_v54, %s1596_s22 }
 0x623   :  { %v358_v55 = vpop.permute.xlu1 %357 }
 0x624   :  { %v360_v56 = vmul.f32 %v358_v55, %v337_v46 }
 0x626   :  { %362 = vrot.lane.b32.xlu0 %v360_v56, %s1595_s21 }
 0x698   :  { %v363_v57 = vpop.permute.xlu0 %362 }
 0x699   :  { %v365_v58 = vadd.f32 %v1467_v51, %v363_v57 }
 0x69b   :  { %v367_v59 = vrot.slane %v365_v58, 1 }
 0x69d   :  { %368 = vrot.lane.b32.xlu1 %v367_v59, %s1594_s2 }
 0x70f   :  { %v369_v60 = vpop.permute.xlu1 %368 }
 0x710   :  { %1306 = vmatmul.mubr.msk.f32.vlgmr.msra.gmra.mrb[2].mxu1 %vm147_vm2, %v369_v60 }
 0x711   :  { %1414 = vmatpush3.bf16.msra.mxu1 %v1666_v5  ;;  %1327 = vmatprep.mubr.msk.f32.mxu1 %vm1592_vm0, %v1593_v1 }
 0x712   :  { %1415 = vmatprep.subr.bf16.mxu1 %v1591_v0 }
 0x715   :  { %1417 = vmatpush3.bf16.msra.mxu1 %v1669_v11 }
 0x716   :  { %1424 = vmatprep.subr.bf16.mxu1 %v1591_v0 }
 0x7e3   :  { %v438_v61 = vpop.f32.mrb[2].mxu1 }
 0x7e4   :  { %v449_v62 = vadd.f32 %v438_v61, %v1689_v15  ;;  %v1307_v63 = vpop.f32.mrb[3].mxu1  ;;  %v443_v3 = vrot.slane %v438_v61, 6 }
 0x7e6   :  { %v451_v2 = vrot.slane %v449_v62, 6  ;;  %v445_v4 = vadd.f32 %v443_v3, %v1693_v21 }
 0x7e8   :  { %452 = vrot.lane.b32.xlu0 %v451_v2, %s1594_s2  ;;  %1468 = vtanh.f32 %v445_v4 }
 0x7f2   :  { %v1469_v6 = vpop.eup %1468 }
 0x7f3   :  { %v447_v7 = vmul.f32 0.5, %v1469_v6 }
 0x7f5   :  { %v448_v8 = vadd.f32 0.5, %v447_v7 }
 0x85a   :  { %v453_v9 = vpop.permute.xlu0 %452 }
 0x85b   :  { %v455_v10 = vmul.f32 %v453_v9, %v448_v8 }
 0x85d   :  { %457 = vrot.lane.b32.xlu1 %v455_v10, %s1594_s2 }
 0x8cf   :  { %v458_v12 = vpop.permute.xlu1 %457 }
 0x8d0   :  { %v460_v13 = vadd.f32 %v458_v12, %v1693_v21 }
 0x8d2   :  { %1470 = vtanh.f32 %v460_v13 }
 0x8dc   :  { %v1471_v14 = vpop.eup %1470 }
 0x8dd   :  { %v463_v16 = vrot.slane %v1471_v14, 1 }
 0x8df   :  { %v465_v17 = vsub.f32 %v365_v58, %v463_v16 }
 0x8e1   :  { %v467_v18 = vrot.slane %v465_v17, 7 }
 0x8e3   :  { %468 = vrot.lane.b32.xlu0 %v467_v18, %s1596_s22 }
 0x955   :  { %v469_v19 = vpop.permute.xlu0 %468 }
 0x956   :  { %v471_v20 = vmul.f32 %v469_v19, %v448_v8 }
 0x958   :  { %473 = vrot.lane.b32.xlu1 %v471_v20, %s1595_s21 }
 0x9ca   :  { %v474_v22 = vpop.permute.xlu1 %473 }
 0x9cb   :  { %v476_v23 = vadd.f32 %v1471_v14, %v474_v22 }
 0x9cd   :  { %v478_v24 = vrot.slane %v476_v23, 2 }
 0x9cf   :  { %479 = vrot.lane.b32.xlu0 %v478_v24, %s1594_s2 }
 0xa41   :  { %v480_v25 = vpop.permute.xlu0 %479 }
 0xa42   :  { %1317 = vmatmul.mubr.msk.f32.vlgmr.msra.gmra.mrb[4].mxu0 %vm147_vm2, %v480_v25 }
 0xa43   :  { %1420 = vmatpush3.bf16.msra.mxu0 %v1666_v5  ;;  %1338 = vmatprep.mubr.msk.f32.mxu0 %vm1592_vm0, %v1593_v1 }
 0xa44   :  { %1421 = vmatprep.subr.bf16.mxu0 %v1591_v0 }
 0xa47   :  { %1423 = vmatpush3.bf16.msra.mxu0 %v1669_v11 }
 0xa48   :  { %1430 = vmatprep.subr.bf16.mxu0 %v1591_v0 }
 0xb15   :  { %v549_v26 = vpop.f32.mrb[4].mxu0 }
 0xb16   :  { %v560_v27 = vadd.f32 %v549_v26, %v1689_v15  ;;  %v1318_v28 = vpop.f32.mrb[5].mxu0  ;;  %v554_v30 = vrot.slane %v549_v26, 5 }
 0xb18   :  { %v562_v29 = vrot.slane %v560_v27, 5  ;;  %v556_v31 = vadd.f32 %v554_v30, %v1693_v21 }
 0xb1a   :  { %563 = vrot.lane.b32.xlu1 %v562_v29, %s1594_s2  ;;  %1472 = vtanh.f32 %v556_v31 }
 0xb24   :  { %v1473_v32 = vpop.eup %1472 }
 0xb25   :  { %v558_v33 = vmul.f32 0.5, %v1473_v32 }
 0xb27   :  { %v559_v34 = vadd.f32 0.5, %v558_v33 }
 0xb8c   :  { %v564_v35 = vpop.permute.xlu1 %563 }
 0xb8d   :  { %v566_v36 = vmul.f32 %v564_v35, %v559_v34 }
 0xb8f   :  { %568 = vrot.lane.b32.xlu0 %v566_v36, %s1594_s2 }
 0xc01   :  { %v569_v37 = vpop.permute.xlu0 %568 }
 0xc02   :  { %v571_v38 = vadd.f32 %v569_v37, %v1693_v21 }
 0xc04   :  { %1474 = vtanh.f32 %v571_v38 }
 0xc0e   :  { %v1475_v39 = vpop.eup %1474 }
 0xc0f   :  { %v574_v40 = vrot.slane %v1475_v39, 1 }
 0xc11   :  { %v576_v41 = vsub.f32 %v476_v23, %v574_v40 }
 0xc13   :  { %v578_v42 = vrot.slane %v576_v41, 7 }
 0xc15   :  { %579 = vrot.lane.b32.xlu1 %v578_v42, %s1596_s22 }
 0xc87   :  { %v580_v43 = vpop.permute.xlu1 %579 }
 0xc88   :  { %v582_v44 = vmul.f32 %v580_v43, %v559_v34 }
 0xc8a   :  { %584 = vrot.lane.b32.xlu0 %v582_v44, %s1595_s21 }
 0xcfc   :  { %v585_v45 = vpop.permute.xlu0 %584 }
 0xcfd   :  { %v587_v46 = vadd.f32 %v1475_v39, %v585_v45 }
 0xcff   :  { %v589_v47 = vrot.slane %v587_v46, 3 }
 0xd01   :  { %590 = vrot.lane.b32.xlu1 %v589_v47, %s1594_s2 }
 0xd73   :  { %v591_v48 = vpop.permute.xlu1 %590 }
 0xd74   :  { %1328 = vmatmul.mubr.msk.f32.vlgmr.msra.gmra.mrb[4].mxu1 %vm147_vm2, %v591_v48 }
 0xd75   :  { %1426 = vmatpush3.bf16.msra.mxu1 %v1666_v5  ;;  %1349 = vmatprep.mubr.msk.f32.mxu1 %vm1592_vm0, %v1593_v1 }
 0xd76   :  { %1427 = vmatprep.subr.bf16.mxu1 %v1591_v0 }
 0xd79   :  { %1429 = vmatpush3.bf16.msra.mxu1 %v1669_v11 }
 0xd7a   :  { %1436 = vmatprep.subr.bf16.mxu1 %v1591_v0 }
 0xe47   :  { %v660_v49 = vpop.f32.mrb[4].mxu1 }
 0xe48   :  { %v671_v50 = vadd.f32 %v660_v49, %v1689_v15  ;;  %v1329_v51 = vpop.f32.mrb[5].mxu1  ;;  %v665_v53 = vrot.slane %v660_v49, 4 }
 0xe4a   :  { %v673_v52 = vrot.slane %v671_v50, 4  ;;  %v667_v54 = vadd.f32 %v665_v53, %v1693_v21 }
 0xe4c   :  { %674 = vrot.lane.b32.xlu0 %v673_v52, %s1594_s2  ;;  %1476 = vtanh.f32 %v667_v54 }
 0xe56   :  { %v1477_v55 = vpop.eup %1476 }
 0xe57   :  { %v669_v56 = vmul.f32 0.5, %v1477_v55 }
 0xe59   :  { %v670_v57 = vadd.f32 0.5, %v669_v56 }
 0xebe   :  { %v675_v58 = vpop.permute.xlu0 %674 }
 0xebf   :  { %v677_v59 = vmul.f32 %v675_v58, %v670_v57 }
 0xec1   :  { %679 = vrot.lane.b32.xlu1 %v677_v59, %s1594_s2 }
 0xf33   :  { %v680_v60 = vpop.permute.xlu1 %679 }
 0xf34   :  { %v682_v61 = vadd.f32 %v680_v60, %v1693_v21 }
 0xf36   :  { %1478 = vtanh.f32 %v682_v61 }
 0xf40   :  { %v1479_v62 = vpop.eup %1478 }
 0xf41   :  { %v685_v63 = vrot.slane %v1479_v62, 1 }
 0xf43   :  { %v687_v2 = vsub.f32 %v587_v46, %v685_v63 }
 0xf45   :  { %v689_v3 = vrot.slane %v687_v2, 7 }
 0xf47   :  { %690 = vrot.lane.b32.xlu0 %v689_v3, %s1596_s22 }
 0xfb9   :  { %v691_v4 = vpop.permute.xlu0 %690 }
 0xfba   :  { %v693_v6 = vmul.f32 %v691_v4, %v670_v57 }
 0xfbc   :  { %695 = vrot.lane.b32.xlu1 %v693_v6, %s1595_s21 }
0x102e   :  { %v696_v7 = vpop.permute.xlu1 %695 }
0x102f   :  { %v698_v8 = vadd.f32 %v1479_v62, %v696_v7 }
0x1031   :  { %v700_v9 = vrot.slane %v698_v8, 4 }
0x1033   :  { %701 = vrot.lane.b32.xlu0 %v700_v9, %s1594_s2 }
0x10a5   :  { %v702_v10 = vpop.permute.xlu0 %701 }
0x10a6   :  { %1339 = vmatmul.mubr.msk.f32.vlgmr.msra.gmra.mrb[6].mxu0 %vm147_vm2, %v702_v10 }
0x10a7   :  { %1432 = vmatpush3.bf16.msra.mxu0 %v1666_v5  ;;  %1360 = vmatprep.mubr.msk.f32.mxu0 %vm1592_vm0, %v1593_v1 }
0x10a8   :  { %1433 = vmatprep.subr.bf16.mxu0 %v1591_v0 }
0x10ab   :  { %1435 = vmatpush3.bf16.msra.mxu0 %v1669_v11 }
0x10ac   :  { %1442 = vmatprep.subr.bf16.mxu0 %v1591_v0 }
0x1179   :  { %v771_v12 = vpop.f32.mrb[6].mxu0 }
0x117a   :  { %v782_v13 = vadd.f32 %v771_v12, %v1689_v15  ;;  %v1340_v14 = vpop.f32.mrb[7].mxu0  ;;  %v776_v17 = vrot.slane %v771_v12, 3 }
0x117b   :  { %v65_v14 = vld [vmem:[#allocation5 + $0x40] sm:$0xff] }
0x117c   :  { %v784_v16 = vrot.slane %v782_v13, 3  ;;  %v778_v18 = vadd.f32 %v776_v17, %v1693_v21  ;;  %v64_v13 = vld [vmem:[#allocation5 + $0x38] sm:$0xff] }
0x117d   :  { %v1437_v17 = vpack.c.bf16 %v65_v14, %v64_v13 }
0x117e   :  { %785 = vrot.lane.b32.xlu1 %v784_v16, %s1594_s2  ;;  %1480 = vtanh.f32 %v778_v18  ;;  %v66_v16 = vld [vmem:[#allocation5 + $0x48] sm:$0xff]  ;;  %v67_v18 = vld [vmem:[#allocation5 + $0x50] sm:$0xff] }
0x1188   :  { %v1481_v5 = vpop.eup %1480 }
0x1189   :  { %v780_v19 = vmul.f32 0.5, %v1481_v5  ;;  %v1440_v5 = vpack.c.bf16 %v67_v18, %v66_v16 }
0x118b   :  { %v781_v20 = vadd.f32 0.5, %v780_v19 }
0x11f0   :  { %v786_v22 = vpop.permute.xlu1 %785 }
0x11f1   :  { %v788_v23 = vmul.f32 %v786_v22, %v781_v20  ;;  %v1110_v22 = vld [vmem:[#allocation7 + $0x8] sm:$0xff] }
0x11f3   :  { %790 = vrot.lane.b32.xlu0 %v788_v23, %s1594_s2 }
0x1265   :  { %v791_v11 = vpop.permute.xlu0 %790 }
0x1266   :  { %v793_v24 = vadd.f32 %v791_v11, %v1693_v21 }
0x1268   :  { %1482 = vtanh.f32 %v793_v24 }
0x1272   :  { %v1483_v25 = vpop.eup %1482 }
0x1273   :  { %v796_v26 = vrot.slane %v1483_v25, 1 }
0x1275   :  { %v798_v27 = vsub.f32 %v698_v8, %v796_v26 }
0x1277   :  { %v800_v28 = vrot.slane %v798_v27, 7  ;;  %v1111_v27 = vld [vmem:[#allocation7 + $0x10] sm:$0xff] }
0x1279   :  { %801 = vrot.lane.b32.xlu1 %v800_v28, %s1596_s22  ;;  %v1112_v28 = vld [vmem:[#allocation7 + $0x18] sm:$0xff] }
0x12eb   :  { %v802_v29 = vpop.permute.xlu1 %801 }
0x12ec   :  { %v804_v30 = vmul.f32 %v802_v29, %v781_v20  ;;  %v1446_v29 = vpack.c.bf16 %v1112_v28, %v1111_v27 }
0x12ee   :  { %806 = vrot.lane.b32.xlu0 %v804_v30, %s1595_s21  ;;  %v57_v30 = vld [vmem:[#allocation5 + $0x3] sm:$0x1] }
0x1360   :  { %v807_v31 = vpop.permute.xlu0 %806 }
0x1361   :  { %v809_v32 = vadd.f32 %v1483_v25, %v807_v31 }
0x1363   :  { %v811_v33 = vrot.slane %v809_v32, 5 }
0x1365   :  { %812 = vrot.lane.b32.xlu1 %v811_v33, %s1594_s2 }
0x13d7   :  { %v813_v34 = vpop.permute.xlu1 %812 }
0x13d8   :  { %1350 = vmatmul.mubr.msk.f32.vlgmr.msra.gmra.mrb[6].mxu1 %vm147_vm2, %v813_v34 }
0x13d9   :  { %1371 = vmatprep.mubr.msk.f32.mxu1 %vm1592_vm0, %v1593_v1  ;;  %1438 = vmatpush3.bf16.msra.mxu1 %v1437_v17 }
0x13da   :  { %1439 = vmatprep.subr.bf16.mxu1 %v1591_v0 }
0x13dd   :  { %1441 = vmatpush3.bf16.msra.mxu1 %v1440_v5 }
0x14ab   :  { %v882_v35 = vpop.f32.mrb[6].mxu1 }
0x14ac   :  { %v893_v36 = vadd.f32 %v882_v35, %v1689_v15  ;;  %v1351_v37 = vpop.f32.mrb[7].mxu1  ;;  %v887_v39 = vrot.slane %v882_v35, 2 }
0x14ae   :  { %v895_v38 = vrot.slane %v893_v36, 2  ;;  %v889_v40 = vadd.f32 %v887_v39, %v1693_v21 }
0x14b0   :  { %896 = vrot.lane.b32.xlu0 %v895_v38, %s1594_s2  ;;  %1484 = vtanh.f32 %v889_v40 }
0x14ba   :  { %v1485_v41 = vpop.eup %1484 }
0x14bb   :  { %v891_v42 = vmul.f32 0.5, %v1485_v41 }
0x14bd   :  { %v892_v43 = vadd.f32 0.5, %v891_v42 }
0x1522   :  { %v897_v44 = vpop.permute.xlu0 %896 }
0x1523   :  { %v899_v45 = vmul.f32 %v897_v44, %v892_v43 }
0x1525   :  { %901 = vrot.lane.b32.xlu1 %v899_v45, %s1594_s2 }
0x1597   :  { %v902_v46 = vpop.permute.xlu1 %901 }
0x1598   :  { %v904_v47 = vadd.f32 %v902_v46, %v1693_v21 }
0x159a   :  { %1486 = vtanh.f32 %v904_v47 }
0x15a4   :  { %v1487_v48 = vpop.eup %1486 }
0x15a5   :  { %v907_v49 = vrot.slane %v1487_v48, 1 }
0x15a7   :  { %v909_v50 = vsub.f32 %v809_v32, %v907_v49 }
0x15a9   :  { %v911_v51 = vrot.slane %v909_v50, 7 }
0x15ab   :  { %912 = vrot.lane.b32.xlu0 %v911_v51, %s1596_s22 }
0x161d   :  { %v913_v52 = vpop.permute.xlu0 %912 }
0x161e   :  { %v915_v53 = vmul.f32 %v913_v52, %v892_v43 }
0x1620   :  { %917 = vrot.lane.b32.xlu1 %v915_v53, %s1595_s21 }
0x1692   :  { %v918_v54 = vpop.permute.xlu1 %917 }
0x1693   :  { %v920_v55 = vadd.f32 %v1487_v48, %v918_v54 }
0x1695   :  { %v922_v56 = vrot.slane %v920_v55, 6 }
0x1697   :  { %923 = vrot.lane.b32.xlu0 %v922_v56, %s1594_s2 }
0x1709   :  { %v924_v57 = vpop.permute.xlu0 %923 }
0x170a   :  { %1361 = vmatmul.mubr.msk.f32.vlgmr.msra.gmra.mrb[8].mxu0 %vm147_vm2, %v924_v57 }
0x170b   :  { %1382 = vmatprep.mubr.msk.f32.mxu0 %vm1592_vm0, %v1593_v1 }
0x17dd   :  { %v993_v58 = vpop.f32.mrb[8].mxu0 }
0x17de   :  { %v1004_v59 = vadd.f32 %v993_v58, %v1689_v15  ;;  %v1362_v60 = vpop.f32.mrb[9].mxu0  ;;  %v998_v62 = vrot.slane %v993_v58, 1 }
0x17e0   :  { %v1006_v61 = vrot.slane %v1004_v59, 1  ;;  %v1000_v63 = vadd.f32 %v998_v62, %v1693_v21 }
0x17e2   :  { %1007 = vrot.lane.b32.xlu1 %v1006_v61, %s1594_s2  ;;  %1488 = vtanh.f32 %v1000_v63 }
0x17ec   :  { %v1489_v2 = vpop.eup %1488 }
0x17ed   :  { %v1002_v3 = vmul.f32 0.5, %v1489_v2 }
0x17ef   :  { %v1003_v4 = vadd.f32 0.5, %v1002_v3 }
0x1854   :  { %v1008_v6 = vpop.permute.xlu1 %1007 }
0x1855   :  { %v1010_v7 = vmul.f32 %v1008_v6, %v1003_v4 }
0x1857   :  { %1012 = vrot.lane.b32.xlu0 %v1010_v7, %s1594_s2 }
0x18c9   :  { %v1013_v8 = vpop.permute.xlu0 %1012 }
0x18ca   :  { %v1015_v1 = vadd.f32 %v1013_v8, %v1693_v21  ;;  %v1109_v21 = vld [vmem:[#allocation7] sm:$0xff] }
0x18cb   :  { %v1443_v23 = vpack.c.bf16 %v1110_v22, %v1109_v21 }
0x18cc   :  { %1490 = vtanh.f32 %v1015_v1 }
0x18cd   :  { %1444 = vmatpush3.bf16.msra.mxu0 %v1443_v23 }
0x18ce   :  { %1445 = vmatprep.subr.bf16.mxu0 %v1591_v0 }
0x18d1   :  { %1447 = vmatpush3.bf16.msra.mxu0 %v1446_v29 }
0x18d6   :  { %v1491_v15 = vpop.eup %1490 }
0x18d7   :  { %v1018_v9 = vrot.slane %v1491_v15, 1 }
0x18d9   :  { %v1020_v10 = vsub.f32 %v920_v55, %v1018_v9 }
0x18db   :  { %v1022_v12 = vrot.slane %v1020_v10, 7 }
0x18dd   :  { %1023 = vrot.lane.b32.xlu1 %v1022_v12, %s1596_s22 }
0x194f   :  { %v1024_v19 = vpop.permute.xlu1 %1023 }
0x1950   :  { %v1026_v20 = vmul.f32 %v1024_v19, %v1003_v4 }
0x1952   :  { %1028 = vrot.lane.b32.xlu0 %v1026_v20, %s1595_s21 }
0x19c4   :  { %v1029_v11 = vpop.permute.xlu0 %1028 }
0x19c5   :  { %v1031_v24 = vadd.f32 %v1491_v15, %v1029_v11 }
0x19c7   :  { %v1033_v25 = vrot.slane %v1031_v24, 7 }
0x19c9   :  { %1034 = vrot.lane.b32.xlu1 %v1033_v25, %s1594_s2 }
0x1a3b   :  { %v1035_v26 = vpop.permute.xlu1 %1034 }
0x1a3c   :  { %1372 = vmatmul.mubr.msk.f32.vlgmr.msra.gmra.mrb[8].mxu1 %vm147_vm2, %v1035_v26 }
0x1b0f   :  { %v1104_v31 = vpop.f32.mrb[8].mxu1 }
0x1b10   :  { %v1105_v32 = vadd.f32 %v1104_v31, %v57_v30  ;;  %v1373_v33 = vpop.f32.mrb[9].mxu1 }
0x1b12   :  { %v1108_v34 = vmax.f32 %v1105_v32, 0.0 }
0x1b14   :  { %1383 = vmatmul.mubr.msk.f32.vlgmr.msra.gmra.mrb[10].mxu0 %vm147_vm2, %v1108_v34 }
0x1be7   :  { %v1182_v0 = vpop.f32.mrb[10].mxu0 }
0x1be8   :  { %1186 = vst [vmem:[#allocation8] sm:$0x1] %v1182_v0  ;;  %v1384_v35 = vpop.f32.mrb[11].mxu0 }
0x1be9   :  { %1569 = shalt.err (!%p1566_p0)
}
0x1bea   :  { %s1570_s29 = scalar_lea.hbm %s1818_s3, 16 }
0x1beb   :  { %p1571_p1 = scmp.ne.s32.totalorder %s1818_s3, %s1570_s29  ;;  %p1574_p2 = scmp.lt.u32.totalorder %s1570_s29, %s1818_s3 }
0x1bed   :  { %p1576_p3 = pnand %p1574_p2, %p1571_p1 }
0x1bef   :  { %1579 = shalt.err (!%p1576_p3)
}
0x1bf0   :  { %1196 = dma.vmem_to_hbm [thread:$0]  %s1194_s24, 16, %s1818_s3, [#allocation4]  }
0x1bf1   :  { %1584 = dma.done.wait [#allocation4], 16  }
0x1bf2   :  { %1585 = vsyncadd [#allocation4], 4294967280 }
0x1bf3   :  { %1200 = vsyncpa [#allocation3], 1 }
0x1bf4   :  { %1201 = vsyncpa [#allocation6], 1 }
0x1bf5   :  { %1202 = vsyncpa [#allocation4], 1 }

</bundles_post_ra>
